<compile_context>
chip_gen: v7x
topology: tpu7x:2x2x1
jax: 0.10.0
libtpu: 0.0.40
codegen_flags: <defaults>
</compile_context>

<pallas_src>
import functools

import jax
import jax.numpy as jnp
from jax.experimental import pallas as pl
from jax.experimental.pallas import tpu as pltpu


def _layernorm_kernel(x_ref, a_ref, b_ref, o_ref, *, eps: float):
    # x_ref: (row_tile, hidden); a_ref/b_ref: (1, hidden) f32, resident across grid.
    x = x_ref[...].astype(jnp.float32)
    n = x.shape[-1]
    mean = jnp.mean(x, axis=-1, keepdims=True)
    diff = x - mean
    # torch.std default is the unbiased estimator (divide by N-1); eps is added
    # to the std (not the variance) to match the module.
    var = jnp.sum(diff * diff, axis=-1, keepdims=True) * (1.0 / (n - 1))
    std = jnp.sqrt(var)
    # Exact reciprocal on the (row_tile, 1) column (cheap), then a broadcast
    # multiply -- avoids a full (row_tile, hidden) divide on the VPU while
    # keeping full f32 accuracy (the previous approx reciprocal failed the
    # accuracy check).
    inv = 1.0 / (std + eps)
    y = (diff * inv) * a_ref[...] + b_ref[...]
    o_ref[...] = y.astype(o_ref.dtype)


def _round_up(v, m):
    return (v + m - 1) // m * m


def _vmem_plan():
    """(vmem_limit_bytes, tile_budget_bytes) sized off the actual chip."""
    try:
        cap = pltpu.get_tpu_info().vmem_capacity_bytes
    except Exception:
        cap = 64 << 20  # conservative fallback (v7x per-TC) off-TPU / interpret
    # Leave >=16 MiB headroom for compiler scratch / semaphores / pipeline
    # bookkeeping; spend ~2/3 of the limit on our tiles + f32 temporaries.
    limit = max(32 << 20, min(cap - (16 << 20), 96 << 20))
    budget = (limit * 2) // 3
    return int(limit), int(budget)


def _choose_row_tile(rows, hidden, itemsize, *, pack,
                     max_tile=8192, vmem_budget_bytes=32 << 20):
    """Largest packing-aligned row tile whose working set fits the budget."""
    # HBM-facing tiles are double-buffered (2 in + 2 out) at the input dtype;
    # the kernel body additionally materializes ~3 f32 (row_tile, hidden)
    # values (x.astype(f32), diff, y), single-buffered.
    per_row_bytes = 4 * hidden * itemsize + 3 * 4 * hidden
    tile = vmem_budget_bytes // max(per_row_bytes, 1)
    tile = max(pack, min(tile, max_tile))
    tile = min(tile, _round_up(rows, pack))          # don't exceed the row count
    if rows > pack:
        # Keep at least 2 (balanced) grid steps so the ("parallel",) axis can
        # shard across both v7x TensorCores; no effect on v5e/v6e (1 TC).
        tile = min(tile, _round_up(-(-rows // 2), pack))
    tile = max(pack, (tile // pack) * pack)          # sublane-packing aligned
    return int(tile)


def layer_norm(x, a_2, b_2, eps=1e-9, row_tile=None):
    """x: (..., hidden); a_2, b_2: (hidden,). Matches the torch module's math."""
    orig_shape = x.shape
    hidden = orig_shape[-1]
    x2 = x.reshape(-1, hidden)
    rows = x2.shape[0]

    itemsize = jnp.dtype(x.dtype).itemsize
    pack = max(8, (4 // max(itemsize, 1)) * 8)       # 8 f32 / 16 bf16 / 32 int8
    vmem_limit, vmem_budget = _vmem_plan()
    if row_tile is None:
        row_tile = _choose_row_tile(rows, hidden, itemsize, pack=pack,
                                    vmem_budget_bytes=vmem_budget)

    num_tiles = pl.cdiv(rows, row_tile)

    # Hoist gamma/beta cast out of the kernel loop; they stay VMEM-resident
    # across the whole grid (index_map always returns (0, 0)).
    a2 = a_2.astype(jnp.float32).reshape(1, hidden)
    b2 = b_2.astype(jnp.float32).reshape(1, hidden)

    kernel = functools.partial(_layernorm_kernel, eps=float(eps))

    # NOTE: no padding / output slicing. When rows % row_tile != 0 the ragged
    # edge block over-reads undefined rows; every row's math is independent and
    # the out-of-range writes are masked by Pallas, so this is harmless. Do NOT
    # "fix" it with jnp.pad + out[:rows] -- that would stream the whole tensor
    # through HBM two extra times (this kernel is HBM-bandwidth-bound).
    #
    # Production note: keep `hidden` a multiple of 128 for lane-dense
    # (unmasked) stores; hidden == full array dim still lowers otherwise.
    out = pl.pallas_call(
        kernel,
        out_shape=jax.ShapeDtypeStruct((rows, hidden), x.dtype),
        grid_spec=pltpu.PrefetchScalarGridSpec(
            num_scalar_prefetch=0,
            grid=(num_tiles,),
            in_specs=[
                pl.BlockSpec((row_tile, hidden), lambda i: (i, 0)),
                pl.BlockSpec((1, hidden), lambda i: (0, 0)),
                pl.BlockSpec((1, hidden), lambda i: (0, 0)),
            ],
            out_specs=pl.BlockSpec((row_tile, hidden), lambda i: (i, 0)),
        ),
        compiler_params=pltpu.CompilerParams(
            dimension_semantics=("parallel",),   # sharded across TCs on v7x
            vmem_limit_bytes=vmem_limit,         # chip-aware, with headroom
        ),
    )(x2, a2, b2)

    return out.reshape(orig_shape)


def _reference(x, a_2, b_2, eps=1e-9):
    xf = x.astype(jnp.float32)
    mean = jnp.mean(xf, axis=-1, keepdims=True)
    n = xf.shape[-1]
    var = jnp.sum((xf - mean) ** 2, axis=-1, keepdims=True) / (n - 1)
    std = jnp.sqrt(var)
    return (a_2.astype(jnp.float32) * (xf - mean) / (std + eps)
            + b_2.astype(jnp.float32)).astype(x.dtype)


if __name__ == "__main__":
    key = jax.random.PRNGKey(0)
    k1, k2, k3, k4 = jax.random.split(key, 4)

    # Lane-dense demo shape (hidden = 128), non-trivial gamma/beta.
    batch, seq, hidden = 2, 8, 128
    x = jax.random.normal(k1, (batch, seq, hidden), dtype=jnp.float32)
    a_2 = 1.0 + 0.1 * jax.random.normal(k2, (hidden,), dtype=jnp.float32)
    b_2 = 0.1 * jax.random.normal(k3, (hidden,), dtype=jnp.float32)

    out = jax.block_until_ready(layer_norm(x, a_2, b_2, eps=1e-9))
    ref = _reference(x, a_2, b_2, eps=1e-9)
    assert out.shape == x.shape and out.dtype == x.dtype
    assert jnp.allclose(out, ref, atol=1e-5, rtol=1e-5)

    # Non-divisible row count (ragged edge block) and small hidden.
    x2 = jax.random.normal(k4, (3, 5, 32), dtype=jnp.float32)  # rows = 15
    a_2b = jnp.ones((32,), dtype=jnp.float32)
    b_2b = jnp.zeros((32,), dtype=jnp.float32)
    out2 = jax.block_until_ready(layer_norm(x2, a_2b, b_2b, eps=1e-9))
    ref2 = _reference(x2, a_2b, b_2b, eps=1e-9)
    assert out2.shape == x2.shape
    assert jnp.allclose(out2, ref2, atol=1e-5, rtol=1e-5)

    # bf16 input (exercises the 16-row sublane-packing alignment path).
    xb = x.astype(jnp.bfloat16)
    out3 = jax.block_until_ready(layer_norm(xb, a_2, b_2, eps=1e-9))
    ref3 = _reference(xb, a_2, b_2, eps=1e-9)
    assert out3.dtype == jnp.bfloat16
    assert jnp.allclose(out3.astype(jnp.float32), ref3.astype(jnp.float32),
                        atol=2e-2, rtol=2e-2)

    print("KERNEL_OK")
</pallas_src>

<mosaic_0001>
module attributes {stable_mosaic.version = 11 : i64} {
  func.func @_layernorm_kernel(%arg0: i32, %arg1: memref<8x128xf32, #tpu.memory_space<vmem>>, %arg2: memref<1x128xf32, #tpu.memory_space<vmem>>, %arg3: memref<1x128xf32, #tpu.memory_space<vmem>>, %arg4: memref<8x128xf32, #tpu.memory_space<vmem>>) attributes {dimension_semantics = [#tpu.dimension_semantics<parallel>], iteration_bounds = array<i64: 2>, scalar_prefetch = 0 : i64, scratch_operands = 0 : i64, tpu.core_type = #tpu.core_type<tc>, window_params = [{transform_indices = @transform_0, window_bounds = array<i64: 8, 128>}, {pipeline_mode = #tpu.pipeline_mode<synchronous>, transform_indices = @transform_1, window_bounds = array<i64: 1, 128>}, {pipeline_mode = #tpu.pipeline_mode<synchronous>, transform_indices = @transform_2, window_bounds = array<i64: 1, 128>}, {transform_indices = @transform_3, window_bounds = array<i64: 8, 128>}]} {
    %c0 = arith.constant 0 : index
    %c0_0 = arith.constant 0 : index
    %0 = vector.load %arg1[%c0, %c0_0] : memref<8x128xf32, #tpu.memory_space<vmem>>, vector<8x128xf32>
    %cst = arith.constant dense<0.000000e+00> : vector<8xf32>
    %1 = vector.multi_reduction <add>, %0, %cst [1] : vector<8x128xf32> to vector<8xf32>
    %2 = vector.shape_cast %1 : vector<8xf32> to vector<8x1xf32>
    %cst_1 = arith.constant 1.280000e+02 : f32
    %3 = vector.broadcast %cst_1 : f32 to vector<8x1xf32>
    %4 = arith.divf %2, %3 : vector<8x1xf32>
    %5 = vector.broadcast %4 : vector<8x1xf32> to vector<8x128xf32>
    %6 = arith.subf %0, %5 : vector<8x128xf32>
    %7 = arith.mulf %6, %6 : vector<8x128xf32>
    %cst_2 = arith.constant dense<0.000000e+00> : vector<8xf32>
    %8 = vector.multi_reduction <add>, %7, %cst_2 [1] : vector<8x128xf32> to vector<8xf32>
    %9 = vector.shape_cast %8 : vector<8xf32> to vector<8x1xf32>
    %cst_3 = arith.constant 0.00787401571 : f32
    %10 = vector.broadcast %cst_3 : f32 to vector<8x1xf32>
    %11 = arith.mulf %9, %10 : vector<8x1xf32>
    %12 = math.sqrt %11 : vector<8x1xf32>
    %cst_4 = arith.constant 9.99999971E-10 : f32
    %13 = vector.broadcast %cst_4 : f32 to vector<8x1xf32>
    %14 = arith.addf %12, %13 : vector<8x1xf32>
    %cst_5 = arith.constant 1.000000e+00 : f32
    %15 = vector.broadcast %cst_5 : f32 to vector<8x1xf32>
    %16 = arith.divf %15, %14 : vector<8x1xf32>
    %17 = vector.broadcast %16 : vector<8x1xf32> to vector<8x128xf32>
    %18 = arith.mulf %6, %17 : vector<8x128xf32>
    %c0_6 = arith.constant 0 : index
    %c0_7 = arith.constant 0 : index
    %19 = vector.load %arg2[%c0_6, %c0_7] : memref<1x128xf32, #tpu.memory_space<vmem>>, vector<1x128xf32>
    %20 = vector.broadcast %19 : vector<1x128xf32> to vector<8x128xf32>
    %21 = arith.mulf %18, %20 : vector<8x128xf32>
    %c0_8 = arith.constant 0 : index
    %c0_9 = arith.constant 0 : index
    %22 = vector.load %arg3[%c0_8, %c0_9] : memref<1x128xf32, #tpu.memory_space<vmem>>, vector<1x128xf32>
    %23 = vector.broadcast %22 : vector<1x128xf32> to vector<8x128xf32>
    %24 = arith.addf %21, %23 : vector<8x128xf32>
    %c0_10 = arith.constant 0 : index
    %c0_11 = arith.constant 0 : index
    %25 = vector.load %arg4[%c0_10, %c0_11] : memref<8x128xf32, #tpu.memory_space<vmem>>, vector<8x128xf32>
    tpu.vector_store %arg4[%c0_10, %c0_11], %24 {strides = array<i32>} : memref<8x128xf32, #tpu.memory_space<vmem>>, vector<8x128xf32>,
    return
  }
  func.func @transform_0(%arg0: i32) -> (i32, i32) {
    %c0_i32 = arith.constant 0 : i32
    %c0_i32_0 = arith.constant 0 : i32
    return %arg0, %c0_i32 : i32, i32
  }
  func.func @transform_1(%arg0: i32) -> (i32, i32) {
    %c0_i32 = arith.constant 0 : i32
    %c0_i32_0 = arith.constant 0 : i32
    %c0_i32_1 = arith.constant 0 : i32
    return %c0_i32, %c0_i32_0 : i32, i32
  }
  func.func @transform_2(%arg0: i32) -> (i32, i32) {
    %c0_i32 = arith.constant 0 : i32
    %c0_i32_0 = arith.constant 0 : i32
    %c0_i32_1 = arith.constant 0 : i32
    return %c0_i32, %c0_i32_0 : i32, i32
  }
  func.func @transform_3(%arg0: i32) -> (i32, i32) {
    %c0_i32 = arith.constant 0 : i32
    %c0_i32_0 = arith.constant 0 : i32
    return %arg0, %c0_i32 : i32, i32
  }
}

</mosaic_0001>

<bundles_post_ra>
// kernel: tpu_custom_call.1
= control target key start
LH: loop header
LB: loop body
LE: loop exit
PB: predicated region body
PF: predicated region fallthrough
CT: control target
= control target key end

     0   :  { %8 = vsyncpa [#allocation3], 0  ;;  %s659_s0 = inlined_call_operand.hbm [shape: f32[16,128], index: 0, kind: input, shape index: {}]   ;;  %s660_s1 = inlined_call_operand.vmem [shape: f32[1,128], index: 1, kind: input, shape index: {}]   ;;  %s661_s2 = inlined_call_operand.vmem [shape: f32[1,128], index: 2, kind: input, shape index: {}]   ;;  %s662_s3 = inlined_call_operand.hbm [shape: f32[16,128], index: 3, kind: output, shape index: {}]  }
   0x1   :  { %10 = vsyncpa [#allocation3 + $0x1], 0 }
   0x2   :  { %11 = vsyncpa [#allocation4], 0 }
   0x3   :  { %13 = vsyncpa [#allocation4 + $0x1], 0  ;;  %s492_s12 = smov 0   ;;  %s494_s13 = smov 0  }
   0x4   :  { %s496_s14 = smov 0   ;;  %s498_s15 = smov 0  }
   0x5 LB: > { %s513_s16 = sadd.s32 4294967295, %s468_s15   ;;  %s308_s17 = sadd.s32 4294967294, %s468_s15   ;;  %s468_s15 = sphi %s498_s15, %s677_s15   ;;  %s464_s14 = sphi %s496_s14, %s676_s14   ;;  %s460_s13 = sphi %s494_s13, %s675_s13   ;;  %s456_s12 = sphi %s492_s12, %s674_s12  }
   0x6   : > { %s517_s18 = sadd.s32 1, %s468_s15   ;;  %s26_s19 = sadd.s32 1, %s464_s14 }
   0x7   : > { %s23_s20 = ssub.s32 %s468_s15, %s517_s18  ;;  %p33_p0 = scmp.ne.s32.totalorder %s464_s14, %s460_s13 }
   0x8   : > { %p24_p1 = scmp.eq.s32.totalorder %s23_s20, 0  ;;  %p34_p2 = scmp.eq.s32.totalorder %s468_s15, 0 }
   0x9   : > { %p39_p3 = scmp.ne.s32.totalorder %s460_s13, %s456_s12  ;;  %p40_p4 = scmp.eq.s32.totalorder %s513_s16, 0 }
   0xa   : > { %s529_s21 = scalar_select %p24_p1, %s464_s14, %s26_s19  }
   0xb   : > { %p531_p5 = por %p34_p2, %p33_p0  ;;  %p535_p6 = por %p40_p4, %p39_p3 }
   0xc   : > { %p105_p7 = scmp.eq.s32.totalorder %s513_s16, 1  ;;  %p111_p8 = scmp.eq.s32.totalorder %s308_s17, 1 }
   0xd   : > { %p334_p10 = scmp.lt.s32.totalorder %s468_s15, 2  ;;  %s137_s26 = sand.u32 1, %s464_s14  }
   0xe   : > { %p542_p11 = por %p105_p7, %p33_p0  ;;  %p546_p12 = por %p111_p8, %p39_p3 }
   0xf   : > { %s312_s27 = sshll.u32 %s468_s15, 7  ;;  %s311_s28 = sshll.u32 %s137_s26, 3 }
  0x10   : > { %s666_s24 = scalar_select %p542_p11, 1, 0 }
  0x11   : > { %s667_s25 = scalar_select %p546_p12, 1, 0 }
  0x12   : > { %s555_s4 = scalar_lea.hbm %s659_s0, %s312_s27  ;;  %s141_s5 = scalar_lea.vmem [#allocation2], %s311_s28 }
  0x13   : > { %s148_s6 = sshll.u32 %s141_s5, 4  ;;  %p559_p13 = pnand %p334_p10, %p531_p5  ;;  %s563_s6 = int_to_ptr.vmem [resolvable:$true] %s148_s6 }
  0x14   : > { %s138_s8 = scalar_lea.sflag [#allocation3], %s137_s26  ;;  %s372_s9 = scalar_lea.hbm %s555_s4, 128 }
  0x15   : > { %p373_p2 = scmp.ne.s32.totalorder %s555_s4, %s372_s9  ;;  %p374_p3 = pneg %p559_p13 }
  0x16   : > { %s377_s17 = scalar_lea.hbm %s659_s0, 256  ;;  %p378_p5 = scmp.lt.u32.totalorder %s555_s4, %s659_s0 }
  0x17   : > { %p375_p4 = pnand %p374_p3, %p373_p2  ;;  %p379_p8 = scmp.lt.u32.totalorder %s377_s17, %s372_s9 }
  0x18   : > { %p381_p9 = scmp.lt.u32.totalorder %s372_s9, %s555_s4 }
  0x19   : > { %p376_p7 = pneg %p375_p4  ;;  %p380_p10 = por %p379_p8, %p378_p5 }
  0x1b   : > { %p382_p0 = por %p381_p9, %p380_p10 }
  0x1d   : > { %p383_p1 = pnand %p382_p0, %p376_p7 }
  0x1f   : > { %386 = shalt.err (!%p383_p1)
}
  0x20   : > { %s387_s22 = scalar_lea.vmem %s563_s6, 128  ;;  %s470_s26 = smov [#allocation2]  }
  0x21   : > { %p388_p2 = scmp.ne.s32.totalorder %s563_s6, %s387_s22  ;;  %s392_s27 = sshll.u32 %s470_s26, 4  ;;  %s393_s27 = int_to_ptr.vmem [resolvable:$false] %s392_s27 }
  0x22   : > { %s394_s28 = scalar_lea.vmem %s393_s27, 256  ;;  %p395_p11 = scmp.lt.s32.totalorder %s563_s6, %s393_s27 }
  0x23   : > { %p390_p4 = pnand %p388_p2, %p374_p3  ;;  %p396_p5 = scmp.lt.s32.totalorder %s394_s28, %s387_s22 }
  0x25   : > { %p391_p12 = pneg %p390_p4  ;;  %p397_p8 = por %p396_p5, %p395_p11 }
  0x27   : > { %p398_p9 = pnand %p397_p8, %p391_p12 }
  0x29   : > { %401 = shalt.err (!%p398_p9)
}
  0x2a   : > { %329 = dma.hbm_to_vmem [thread:$0]  (!%p559_p13), %s555_s4, 128, %s563_s6, %s138_s8  }
  0x2b   : > { %p669_p0 = scmp.lt.s32.totalorder %s468_s15, 3  ;;  %p670_p1 = scmp.ge.s32.totalorder %s468_s15, 1 }
  0x2d   : > { %p154_p3 = pnand %p670_p1, %p669_p0 }
  0x2e   : > { %s597_s29 = sand.u32 (!%p154_p3), 1, %s460_s13  }
  0x2f   : > { %157 = sbr.rel (%p154_p3) target bundleno = 396 (0x18c), region = 32  ;;  %s314_s30 = sshll.u32 (!%p154_p3), %s597_s29, 3 }
  0x30   : > { %s160_s5 = scalar_lea.sflag (!%p154_p3), [#allocation3], %s597_s29  ;;  %s163_s9 = scalar_lea.vmem (!%p154_p3), [#allocation2], %s314_s30 }
  0x36   : > { %447 = dma.done.wait (%p535_p6), %s160_s5, 128  }
  0x37   : > { %449 = vsyncadd (%p535_p6), %s160_s5, 4294967168  ;;  %v186_v0 = vld [vmem:[%s163_s9] sm:$0xff]  ;;  %s319_s8 = sshll.u32 %s513_s16, 7  ;;  %s185_s10 = scalar_lea.vmem [#allocation5], %s314_s30 }
  0x38   : > { %187 = vadd.xlane.f32.xlu0 %v186_v0  ;;  %v316_v14 = vld [vmem:[%s660_s1] ss:$0 sm:$0xff]  ;;  %s238_s11 = sshll.u32 %s185_s10, 4  ;;  %s615_s20 = scalar_lea.hbm %s662_s3, %s319_s8  ;;  %s617_s11 = int_to_ptr.vmem [resolvable:$true] %s238_s11 }
  0x39   : > { %v317_v16 = vld [vmem:[%s661_s2] ss:$0 sm:$0xff]  ;;  %s225_s22 = scalar_lea.sflag [#allocation4], %s597_s29  ;;  %s402_s26 = scalar_lea.vmem %s617_s11, 128 }
  0x3a   : > { %p403_p6 = scmp.ne.s32.totalorder %s617_s11, %s402_s26  ;;  %p671_p11 = scmp.ne.s32.totalorder %s666_s24, 0 }
  0x3b   : > { %s471_s16 = smov [#allocation5]  }
  0x3c   : > { %p404_p12 = pnand %p403_p6, %p671_p11  ;;  %s406_s27 = sshll.u32 %s471_s16, 4  ;;  %s407_s27 = int_to_ptr.vmem [resolvable:$false] %s406_s27 }
  0x3d   : > { %s408_s28 = scalar_lea.vmem %s407_s27, 256  ;;  %p409_p7 = scmp.lt.s32.totalorder %s617_s11, %s407_s27 }
  0x3e   : > { %p405_p13 = pneg %p404_p12  ;;  %p410_p10 = scmp.lt.s32.totalorder %s408_s28, %s402_s26 }
  0x40   : > { %p411_p2 = por %p410_p10, %p409_p7 }
  0x42   : > { %p412_p4 = pnand %p411_p2, %p405_p13 }
  0xc5   : > { %v188_v1 = vpop.xlane.xlu0 %187 }
  0xc6   : > { %v190_v2 = vmul.f32 0.0078125, %v188_v1 }
  0xc8   : > { %v191_v3 = vsub.f32 %v186_v0, %v190_v2 }
  0xca   : > { %v192_v4 = vmul.f32 %v191_v3, %v191_v3 }
  0xcc   : > { %193 = vadd.xlane.f32.xlu0 %v192_v4 }
 0x159   : > { %v194_v5 = vpop.xlane.xlu0 %193 }
 0x15a   : > { %v195_v6 = vmul.f32 0.007874016, %v194_v5 }
 0x15c   : > { %368 = vrsqrt.f32 %v195_v6  ;;  %vm198_vm0 = vcmp.eq.f32.partialorder %v195_v6, inf  ;;  %v201_v9 = vand.u32 2147483648, %v195_v6  ;;  %vm200_vm1 = vcmp.eq.f32.partialorder %v195_v6, 0.0 }
 0x166   : > { %v369_v7 = vpop.eup %368 }
 0x167   : > { %v197_v8 = vmul.f32 %v369_v7, %v195_v6 }
 0x169   : > { %v199_v10 = vsel %vm198_vm0, %v195_v6, %v197_v8 }
 0x16a   : > { %v202_v11 = vsel %vm200_vm1, %v201_v9, %v199_v10 }
 0x16b   : > { %v203_v12 = vadd.f32 1e-09, %v202_v11 }
 0x16d   : > { %370 = vrcp.f32 %v203_v12 }
 0x177   : > { %v371_v13 = vpop.eup %370 }
 0x178   : > { %v206_v15 = vmul.f32 %v371_v13, %v191_v3 }
 0x17a   : > { %v214_v17 = vmul.f32 %v316_v14, %v206_v15 }
 0x17c   : > { %v222_v18 = vadd.f32 %v317_v16, %v214_v17 }
 0x17e   : > { %223 = vst [vmem:[%s185_s10] sm:$0xff] %v222_v18 }
 0x17f   : > { %415 = shalt.err (!%p412_p4)
}
 0x180   : > { %s416_s29 = scalar_lea.hbm %s615_s20, 128  ;;  %s420_s9 = scalar_lea.hbm %s662_s3, 256 }
 0x181   : > { %p417_p5 = scmp.ne.s32.totalorder %s615_s20, %s416_s29  ;;  %p421_p0 = scmp.lt.u32.totalorder %s615_s20, %s662_s3 }
 0x182   : > { %p422_p1 = scmp.lt.u32.totalorder %s420_s9, %s416_s29  ;;  %p424_p6 = scmp.lt.u32.totalorder %s416_s29, %s615_s20 }
 0x183   : > { %p418_p8 = pnand %p417_p5, %p671_p11 }
 0x184   : > { %p423_p3 = por %p422_p1, %p421_p0 }
 0x185   : > { %p419_p9 = pneg %p418_p8 }
 0x186   : > { %p425_p12 = por %p424_p6, %p423_p3 }
 0x188   : > { %p426_p13 = pnand %p425_p12, %p419_p9 }
 0x18a   : > { %429 = shalt.err (!%p426_p13)
}
 0x18b   : > { %324 = dma.vmem_to_hbm [thread:$0]  (%p671_p11), %s617_s11, 128, %s615_s20, %s225_s22  }
 0x18c PF: > { %s250_s6 = sand.u32 1, %s456_s12   ;;  %p672_p7 = scmp.ne.s32.totalorder %s667_s25, 0 }
 0x18d   : > { %p673_p10 = scmp.ge.s32.totalorder %s468_s15, 2  ;;  %s251_s7 = scalar_lea.sflag [#allocation4], %s250_s6 }
 0x18f   : > { %p331_p2 = pnand %p673_p10, %p672_p7 }
 0x191   : > { %451 = dma.done.wait (!%p331_p2), %s251_s7, 128  }
 0x192   : > { %453 = vsyncadd (!%p331_p2), %s251_s7, 4294967168  ;;  %p16_p4 = scmp.ge.s32.totalorder %s517_s18, 4   ;;  %s674_s12 = smov %s460_s13 }
 0x193   : > { %s675_s13 = smov %s464_s14  ;;  %s676_s14 = smov %s529_s21 }
 0x194   : > { %s677_s15 = smov %s517_s18  ;;  %18 = sbr.rel (!%p16_p4) target bundleno = 5 (0x5), region = 77 }
 0x19b   :  { %256 = vsyncpa [#allocation3], 1 }
 0x19c   :  { %258 = vsyncpa [#allocation3 + $0x1], 1 }
 0x19d   :  { %259 = vsyncpa [#allocation4], 1 }
 0x19e   :  { %261 = vsyncpa [#allocation4 + $0x1], 1 }

</bundles_post_ra>
